<compile_context>
chip_gen: v6e
topology: v6e:2x2x1
jax: 0.10.0
libtpu: 0.0.40
codegen_flags: <defaults>
</compile_context>

<pallas_src>
import functools

import jax
import jax.numpy as jnp
import numpy as np
from jax.experimental import pallas as pl
from jax.experimental.pallas import tpu as pltpu

# Small compat shim in case of version skew on the CompilerParams name.
_COMPILER_PARAMS_CLS = getattr(pltpu, "CompilerParams", None) or getattr(
    pltpu, "TPUCompilerParams"
)


def _bpr_max_kernel(tflat_ref, preds_ref, rowsum_ref, acc_ref, *,
                    padd_idx, tk, tt, rows_per_batch):
    b = pl.program_id(0)
    rt = pl.program_id(1)
    k = pl.program_id(2)
    nk = pl.num_programs(2)

    # ---- init the gathered-logit accumulator for this row tile -------------
    @pl.when(k == 0)
    def _():
        acc_ref[...] = jnp.zeros_like(acc_ref)

    # ---- gather contribution of this vocab tile via a one-hot matmul -------
    # s[r, j] += preds[g0 + r, t[j]]  restricted to the vocab slice of tile k.
    t = tflat_ref[...]                                       # (1, Mp) int32
    mp = t.shape[1]
    v_iota = jax.lax.broadcasted_iota(jnp.int32, (tk, mp), 0) + k * tk
    onehot = (v_iota == t).astype(preds_ref.dtype)           # (TK, Mp), exact
    p_tile = preds_ref[0]                                    # (TT, TK)
    acc_ref[...] += jnp.dot(p_tile, onehot,
                            preferred_element_type=jnp.float32)

    # ---- epilogue: masked softmax x sigmoid, reduced over columns ----------
    @pl.when(k == nk - 1)
    def _():
        s = acc_ref[...]                                     # (TT, Mp) f32
        mc = t != padd_idx                                   # (1, Mp) valid cols
        mcf = mc.astype(jnp.float32)

        neg_big = jnp.float32(-1e30)
        s_m = jnp.where(mc, s, neg_big)
        row_max = jnp.max(s_m, axis=1, keepdims=True)        # (TT, 1)
        e = jnp.exp(s_m - row_max) * mcf                     # unnormalized softmax
        denom = jnp.sum(e, axis=1, keepdims=True)            # (TT, 1)

        # Diagonal of the *global* sampled-logit matrix for each local row:
        # column index == b*Rp + rt*TT + r.  One (TT, Mp) iota compare; no
        # (M, M) int32 temporaries.  The same compare yields the row-validity
        # mask (is the row's own target a non-pad column?).
        g0 = b * rows_per_batch + rt * tt
        col_iota = jax.lax.broadcasted_iota(jnp.int32, (tt, mp), 1)
        row_iota = jax.lax.broadcasted_iota(jnp.int32, (tt, mp), 0)
        is_diag = col_iota == (row_iota + g0)
        diag = jnp.sum(jnp.where(is_diag, s, 0.0), axis=1, keepdims=True)
        row_valid = jnp.sum(jnp.where(is_diag, mcf, 0.0), axis=1, keepdims=True)

        sig = jax.nn.sigmoid(diag - s)                       # (TT, Mp)
        num = jnp.sum(e * sig, axis=1, keepdims=True)        # (TT, 1)

        # Softmax normalization fused into the per-row reduction: a single
        # (TT,1) divide instead of an (M,M) divide / materialized p.
        rowsum = row_valid * num / denom                     # (TT, 1)
        rowsum_ref[...] = rowsum.reshape(1, 1, tt, 1)


def _pick_tile(n, candidates):
    for c in candidates:
        if n % c == 0:
            return c
    return n


def bpr_max_loss(preds, targets, padd_idx):
    """preds: (B, T, V) float, targets: (B, T-1) int -> scalar f32 BPR-max loss."""
    B, T, V = preds.shape
    R = T - 1                          # rows per batch (last timestep dropped)
    Rp = ((R + 7) // 8) * 8            # sublane-aligned rows per batch
    Mp = B * Rp                        # padded flattened row/column count

    # Targets, padded per batch with padd_idx (padded rows/cols are masked out
    # in-kernel, so they contribute nothing).
    tpad = jnp.full((B, Rp), padd_idx, dtype=jnp.int32)
    tpad = tpad.at[:, :R].set(targets.astype(jnp.int32))
    tflat = tpad.reshape(1, Mp)

    # preds is streamed in its native dtype & layout; dropping the last
    # timestep is expressed by the BlockSpec (rows >= R are masked), so no
    # host-side slice/reshape/upcast copy.  Pad time only if the sublane
    # rounding exceeds T (rare, small T).
    preds_in = preds if Rp <= T else jnp.pad(preds, ((0, 0), (0, Rp - T), (0, 0)))

    # Tile sizes: row tile TT (multiple of 8), vocab tile TK (multiple of 128
    # or the full V).  Sized so acc(TT,Mp) + onehot(TK,Mp) + double-buffered
    # preds tiles + epilogue temporaries stay well inside v7x's 64 MiB VMEM.
    TT = Rp if Rp <= 256 else _pick_tile(Rp, (256, 128, 64, 32, 16, 8))
    RT = Rp // TT
    TK = V if V % 128 != 0 else _pick_tile(V, (512, 256, 128))
    KT = V // TK

    kernel = functools.partial(_bpr_max_kernel, padd_idx=int(padd_idx),
                               tk=TK, tt=TT, rows_per_batch=Rp)

    row_sums = pl.pallas_call(
        kernel,
        out_shape=jax.ShapeDtypeStruct((B, RT, TT, 1), jnp.float32),
        grid=(B, RT, KT),
        in_specs=[
            pl.BlockSpec((1, Mp), lambda b, rt, k: (0, 0)),        # targets
            pl.BlockSpec((1, TT, TK), lambda b, rt, k: (b, rt, k)),  # preds tile
        ],
        out_specs=pl.BlockSpec((1, 1, TT, 1), lambda b, rt, k: (b, rt, 0, 0)),
        scratch_shapes=[pltpu.VMEM((TT, Mp), jnp.float32)],
        compiler_params=_COMPILER_PARAMS_CLS(
            dimension_semantics=("parallel", "parallel", "arbitrary"),
            vmem_limit_bytes=48 * 1024 * 1024,   # explicit; < v7x's 64 MiB physical
        ),
    )(tflat, preds_in)

    # Tiny final reduction (Mp floats) done by XLA: mean over the N x N valid
    # block, then -log.  Keeping this outside lets the row/batch grid axes stay
    # "parallel" (megacore) with no cross-tile scalar accumulation.
    total = jnp.sum(row_sums)
    n = jnp.sum((tflat != padd_idx).astype(jnp.float32))
    return -jnp.log(total / (n * n))


def _reference_numpy(preds, targets, padd_idx):
    preds = np.asarray(preds, dtype=np.float64)
    targets = np.asarray(targets)
    V = preds.shape[-1]
    p = preds[:, :-1, :].reshape(-1, V)
    t = targets.reshape(-1)
    mask = t != padd_idx
    sl = p[mask][:, t[mask]]                                   # (N, N)
    sm = np.exp(sl - sl.max(axis=1, keepdims=True))
    sm = sm / sm.sum(axis=1, keepdims=True)
    diff = np.diag(sl)[:, None] - sl
    sig = 1.0 / (1.0 + np.exp(-diff))
    return -np.log(np.mean(sm * sig))


if __name__ == "__main__":
    key = jax.random.PRNGKey(0)
    B, T, V = 2, 9, 256        # M = B*(T-1) = 16, two vocab tiles of 128
    padd_idx = 0

    k1, k2 = jax.random.split(key)
    preds = jax.random.normal(k1, (B, T, V), dtype=jnp.float32)
    targets = jax.random.randint(k2, (B, T - 1), 1, V, dtype=jnp.int32)
    # introduce some padding positions
    targets = targets.at[0, 2].set(padd_idx).at[1, 5].set(padd_idx)

    loss = bpr_max_loss(preds, targets, padd_idx)
    jax.block_until_ready(loss)

    ref = _reference_numpy(np.array(preds), np.array(targets), padd_idx)
    assert np.allclose(float(loss), ref, rtol=1e-4, atol=1e-4), (float(loss), ref)

    print("KERNEL_OK")
</pallas_src>

<mosaic_0001>
module attributes {stable_mosaic.version = 11 : i64} {
  func.func @_bpr_max_kernel(%arg0: i32, %arg1: i32, %arg2: i32, %arg3: memref<1x16xi32, #tpu.memory_space<vmem>>, %arg4: memref<1x8x256xf32, #tpu.memory_space<vmem>>, %arg5: memref<1x1x8x1xf32, #tpu.memory_space<vmem>>, %arg6: memref<8x16xf32, #tpu.memory_space<vmem>>) attributes {dimension_semantics = [#tpu.dimension_semantics<parallel>, #tpu.dimension_semantics<parallel>, #tpu.dimension_semantics<arbitrary>], iteration_bounds = array<i64: 2, 1, 1>, scalar_prefetch = 0 : i64, scratch_operands = 1 : i64, tpu.core_type = #tpu.core_type<tc>, window_params = [{pipeline_mode = #tpu.pipeline_mode<synchronous>, transform_indices = @transform_0, window_bounds = array<i64: 1, 16>}, {transform_indices = @transform_1, window_bounds = array<i64: 1, 8, 256>}, {transform_indices = @transform_2, window_bounds = array<i64: 1, 1, 8, 1>}]} {
    %c0_i32 = arith.constant 0 : i32
    %0 = arith.cmpi eq, %arg2, %c0_i32 : i32
    %1 = arith.extui %0 : i1 to i32
    %c0_i32_0 = arith.constant 0 : i32
    %2 = arith.cmpi ne, %1, %c0_i32_0 : i32
    scf.if %2 {
      %cst_11 = arith.constant 0.000000e+00 : f32
      %21 = vector.broadcast %cst_11 : f32 to vector<8x16xf32>
      %c0_12 = arith.constant 0 : index
      %c0_13 = arith.constant 0 : index
      %22 = vector.load %arg6[%c0_12, %c0_13] : memref<8x16xf32, #tpu.memory_space<vmem>>, vector<8x16xf32>
      tpu.vector_store %arg6[%c0_12, %c0_13], %21 {strides = array<i32>} : memref<8x16xf32, #tpu.memory_space<vmem>>, vector<8x16xf32>,
    } else {
    }
    %c0 = arith.constant 0 : index
    %c0_1 = arith.constant 0 : index
    %3 = vector.load %arg3[%c0, %c0_1] : memref<1x16xi32, #tpu.memory_space<vmem>>, vector<1x16xi32>
    %4 = tpu.iota {dimensions = array<i32: 0>} : vector<256x16xi32>
    %c256_i32 = arith.constant 256 : i32
    %5 = arith.muli %arg2, %c256_i32 : i32
    %6 = vector.broadcast %5 : i32 to vector<256x16xi32>
    %7 = arith.addi %4, %6 : vector<256x16xi32>
    %8 = vector.broadcast %3 : vector<1x16xi32> to vector<256x16xi32>
    %9 = arith.cmpi eq, %7, %8 : vector<256x16xi32>
    %10 = arith.extui %9 : vector<256x16xi1> to vector<256x16xi32>
    %11 = arith.sitofp %10 : vector<256x16xi32> to vector<256x16xf32>
    %c0_2 = arith.constant 0 : index
    %c0_3 = arith.constant 0 : index
    %c0_4 = arith.constant 0 : index
    %12 = vector.load %arg4[%c0_2, %c0_3, %c0_4] : memref<1x8x256xf32, #tpu.memory_space<vmem>>, vector<1x8x256xf32>
    %13 = vector.shape_cast %12 : vector<1x8x256xf32> to vector<8x256xf32>
    %c0_5 = arith.constant 0 : index
    %c0_6 = arith.constant 0 : index
    %14 = vector.load %arg6[%c0_5, %c0_6] : memref<8x16xf32, #tpu.memory_space<vmem>>, vector<8x16xf32>
    %cst = arith.constant dense<0.000000e+00> : vector<8x16xf32>
    %15 = tpu.matmul %13, %11, %cst {dimension_numbers = #tpu.dot_dimension_numbers<[1], [0], [0], [1], [0, 0, 1, 1], [], []>} : vector<8x256xf32>, vector<256x16xf32>, vector<8x16xf32> -> vector<8x16xf32>
    %16 = arith.addf %14, %15 : vector<8x16xf32>
    %c0_7 = arith.constant 0 : index
    %c0_8 = arith.constant 0 : index
    %17 = vector.load %arg6[%c0_7, %c0_8] : memref<8x16xf32, #tpu.memory_space<vmem>>, vector<8x16xf32>
    tpu.vector_store %arg6[%c0_7, %c0_8], %16 {strides = array<i32>} : memref<8x16xf32, #tpu.memory_space<vmem>>, vector<8x16xf32>,
    %c0_i32_9 = arith.constant 0 : i32
    %18 = arith.cmpi eq, %arg2, %c0_i32_9 : i32
    %19 = arith.extui %18 : i1 to i32
    %c0_i32_10 = arith.constant 0 : i32
    %20 = arith.cmpi ne, %19, %c0_i32_10 : i32
    scf.if %20 {
      %c0_11 = arith.constant 0 : index
      %c0_12 = arith.constant 0 : index
      %21 = vector.load %arg6[%c0_11, %c0_12] : memref<8x16xf32, #tpu.memory_space<vmem>>, vector<8x16xf32>
      %c0_i32_13 = arith.constant 0 : i32
      %22 = vector.broadcast %c0_i32_13 : i32 to vector<1x16xi32>
      %23 = arith.cmpi ne, %3, %22 : vector<1x16xi32>
      %24 = arith.extui %23 : vector<1x16xi1> to vector<1x16xi32>
      %25 = arith.sitofp %24 : vector<1x16xi32> to vector<1x16xf32>
      %cst_14 = arith.constant -1.000000e+30 : f32
      %26 = vector.shape_cast %23 : vector<1x16xi1> to vector<1x16xi1>
      %27 = vector.broadcast %26 : vector<1x16xi1> to vector<8x16xi1>
      %28 = vector.broadcast %cst_14 : f32 to vector<8x16xf32>
      %29 = arith.select %27, %21, %28 : vector<8x16xi1>, vector<8x16xf32>
      %cst_15 = arith.constant dense<0xFF800000> : vector<8xf32>
      %30 = vector.multi_reduction <maximumf>, %29, %cst_15 [1] : vector<8x16xf32> to vector<8xf32>
      %31 = vector.shape_cast %30 : vector<8xf32> to vector<8x1xf32>
      %32 = vector.broadcast %31 : vector<8x1xf32> to vector<8x16xf32>
      %33 = arith.subf %29, %32 : vector<8x16xf32>
      %34 = math.exp %33 : vector<8x16xf32>
      %35 = vector.broadcast %25 : vector<1x16xf32> to vector<8x16xf32>
      %36 = arith.mulf %34, %35 : vector<8x16xf32>
      %cst_16 = arith.constant dense<0.000000e+00> : vector<8xf32>
      %37 = vector.multi_reduction <add>, %36, %cst_16 [1] : vector<8x16xf32> to vector<8xf32>
      %38 = vector.shape_cast %37 : vector<8xf32> to vector<8x1xf32>
      %c8_i32 = arith.constant 8 : i32
      %39 = arith.muli %arg0, %c8_i32 : i32
      %c8_i32_17 = arith.constant 8 : i32
      %40 = arith.muli %arg1, %c8_i32_17 : i32
      %41 = arith.addi %39, %40 : i32
      %42 = tpu.iota {dimensions = array<i32: 1>} : vector<8x16xi32>
      %43 = tpu.iota {dimensions = array<i32: 0>} : vector<8x16xi32>
      %44 = vector.broadcast %41 : i32 to vector<8x16xi32>
      %45 = arith.addi %43, %44 : vector<8x16xi32>
      %46 = arith.cmpi eq, %42, %45 : vector<8x16xi32>
      %cst_18 = arith.constant 0.000000e+00 : f32
      %47 = vector.broadcast %cst_18 : f32 to vector<8x16xf32>
      %48 = arith.select %46, %21, %47 : vector<8x16xi1>, vector<8x16xf32>
      %cst_19 = arith.constant dense<0.000000e+00> : vector<8xf32>
      %49 = vector.multi_reduction <add>, %48, %cst_19 [1] : vector<8x16xf32> to vector<8xf32>
      %50 = vector.shape_cast %49 : vector<8xf32> to vector<8x1xf32>
      %cst_20 = arith.constant 0.000000e+00 : f32
      %51 = vector.shape_cast %25 : vector<1x16xf32> to vector<1x16xf32>
      %52 = vector.broadcast %51 : vector<1x16xf32> to vector<8x16xf32>
      %53 = vector.broadcast %cst_20 : f32 to vector<8x16xf32>
      %54 = arith.select %46, %52, %53 : vector<8x16xi1>, vector<8x16xf32>
      %cst_21 = arith.constant dense<0.000000e+00> : vector<8xf32>
      %55 = vector.multi_reduction <add>, %54, %cst_21 [1] : vector<8x16xf32> to vector<8xf32>
      %56 = vector.shape_cast %55 : vector<8xf32> to vector<8x1xf32>
      %57 = vector.broadcast %50 : vector<8x1xf32> to vector<8x16xf32>
      %58 = arith.subf %57, %21 : vector<8x16xf32>
      %59 = arith.negf %58 : vector<8x16xf32>
      %60 = math.exp %59 : vector<8x16xf32>
      %cst_22 = arith.constant 1.000000e+00 : f32
      %61 = vector.broadcast %cst_22 : f32 to vector<8x16xf32>
      %62 = arith.addf %61, %60 : vector<8x16xf32>
      %63 = arith.divf %61, %62 : vector<8x16xf32>
      %64 = arith.mulf %36, %63 : vector<8x16xf32>
      %cst_23 = arith.constant dense<0.000000e+00> : vector<8xf32>
      %65 = vector.multi_reduction <add>, %64, %cst_23 [1] : vector<8x16xf32> to vector<8xf32>
      %66 = vector.shape_cast %65 : vector<8xf32> to vector<8x1xf32>
      %67 = arith.mulf %56, %66 : vector<8x1xf32>
      %68 = arith.divf %67, %38 : vector<8x1xf32>
      %69 = vector.shape_cast %68 : vector<8x1xf32> to vector<1x1x8x1xf32>
      %c0_24 = arith.constant 0 : index
      %c0_25 = arith.constant 0 : index
      %c0_26 = arith.constant 0 : index
      %c0_27 = arith.constant 0 : index
      %70 = vector.load %arg5[%c0_24, %c0_25, %c0_26, %c0_27] : memref<1x1x8x1xf32, #tpu.memory_space<vmem>>, vector<1x1x8x1xf32>
      tpu.vector_store %arg5[%c0_24, %c0_25, %c0_26, %c0_27], %69 {strides = array<i32>} : memref<1x1x8x1xf32, #tpu.memory_space<vmem>>, vector<1x1x8x1xf32>,
    } else {
    }
    return
  }
  func.func @transform_0(%arg0: i32, %arg1: i32, %arg2: i32) -> (i32, i32) {
    %c0_i32 = arith.constant 0 : i32
    %c0_i32_0 = arith.constant 0 : i32
    %c0_i32_1 = arith.constant 0 : i32
    return %c0_i32, %c0_i32_0 : i32, i32
  }
  func.func @transform_1(%arg0: i32, %arg1: i32, %arg2: i32) -> (i32, i32, i32) {
    %c0_i32 = arith.constant 0 : i32
    return %arg0, %arg1, %arg2 : i32, i32, i32
  }
  func.func @transform_2(%arg0: i32, %arg1: i32, %arg2: i32) -> (i32, i32, i32, i32) {
    %c0_i32 = arith.constant 0 : i32
    %c0_i32_0 = arith.constant 0 : i32
    %c0_i32_1 = arith.constant 0 : i32
    return %arg0, %arg1, %c0_i32, %c0_i32_0 : i32, i32, i32, i32
  }
}

</mosaic_0001>

<bundles_post_ra>
// kernel: tpu_custom_call.1
= control target key start
LH: loop header
LB: loop body
LE: loop exit
PB: predicated region body
PF: predicated region fallthrough
CT: control target
= control target key end

     0   :  { %s786_s9 = smov 0   ;;  %s788_s10 = smov 0   ;;  %s961_s0 = inlined_call_operand.vmem [shape: s32[1,16], index: 0, kind: input, shape index: {}]   ;;  %s962_s1 = inlined_call_operand.vmem [shape: f32[2,9,256], index: 1, kind: input, shape index: {}]   ;;  %s963_s2 = inlined_call_operand.vmem [shape: f32[2,1,8,1], index: 2, kind: output, shape index: {}]  }
   0x1   :  { %s790_s11 = smov 0  }
   0x2 LB: > { %s31_s12 = sadd.s32 1, %s762_s10  ;;  %p600_p0 = scmp.ge.s32.totalorder %s766_s11, 1  ;;  %s766_s11 = sphi %s790_s11, %s12_s11   ;;  %s762_s10 = sphi %s788_s10, %s965_s10   ;;  %s758_s9 = sphi %s786_s9, %s964_s9  }
   0x3   : > { %p33_p1 = scmp.ge.s32.totalorder %s31_s12, 2  ;;  %p146_p2 = scmp.lt.s32.totalorder %s766_s11, 3 }
   0x5   : > { %s967_s12 = smov (%p33_p1, %s31_s12), 0  ;;  %p147_p3 = pnand %p600_p0, %p146_p2 }
   0x6   : > { %p179_p4 = scmp.lt.s32.totalorder (!%p147_p3), %s758_s9, 1  ;;  %s669_s20 = sshll.u32 (!%p147_p3), %s758_s9, 3 }
   0x7   : > { %150 = sbr.rel (%p147_p3) target bundleno = 580 (0x244), region = 28 }
   0xc   : > { %v206_v0 = vlaneseq  ;;  %s811_s13 = scalar_select %p179_p4, %s758_s9, 1  ;;  %v816_v2 = vld [vmem:[%s961_s0] sm:$0x1]  ;;  %v768_v13 = vmov 1.0   ;;  %v769_v39 = vmov 0.0   ;;  %v483_v45 = vstv %s669_s20 }
   0xd   : > { %v770_v46 = vmov 0  }
   0xe   : > { %v808_v1 = vshrl.u32 %v206_v0, 7  ;;  %s673_s16 = sshll.u32 %s811_s13, 5  ;;  %v482_v48 = vand.u32 127, %v206_v0  ;;  %s603_s21 = sshll.u32 %s811_s13, 3 }
   0xf   : > { %s829_s19 = scalar_lea.vmem %s962_s1, %s673_s16  ;;  %s198_s24 = scalar_lea.vmem %s963_s2, %s603_s21 }
  0x10   : > { %v238_v3 = vadd.s32 248, %v808_v1  ;;  %v820_v4 = vsub.s32 0, %v808_v1  ;;  %v222_v5 = vadd.s32 120, %v808_v1  ;;  %v237_v6 = vadd.s32 240, %v808_v1  ;;  %v374_v10 = vld [vmem:[%s829_s19 + $0x8] sm:$0xff]  ;;  %v373_v38 = vld [vmem:[%s829_s19] sm:$0xff] }
  0x11   : > { %v221_v7 = vadd.s32 112, %v808_v1  ;;  %v236_v9 = vadd.s32 232, %v808_v1  ;;  %v220_v11 = vadd.s32 104, %v808_v1  ;;  %440 = vmatprep.mubr.f32.mxu0 %v374_v10  ;;  %v235_v12 = vadd.s32 224, %v808_v1 }
  0x12   : > { %v833_v8 = vrot.slane %v816_v2, %v820_v4  ;;  %v219_v14 = vadd.s32 96, %v808_v1  ;;  %v234_v15 = vadd.s32 216, %v808_v1  ;;  %v218_v16 = vadd.s32 88, %v808_v1 }
  0x13   : > { %v233_v17 = vadd.s32 208, %v808_v1  ;;  %v217_v18 = vadd.s32 80, %v808_v1  ;;  %v232_v19 = vadd.s32 200, %v808_v1  ;;  %v216_v20 = vadd.s32 72, %v808_v1 }
  0x14   : > { %vm308_vm0 = vcmp.eq.s32.totalorder %v238_v3, %v833_v8  ;;  %vm292_vm1 = vcmp.eq.s32.totalorder %v222_v5, %v833_v8  ;;  %vm307_vm2 = vcmp.eq.s32.totalorder %v237_v6, %v833_v8  ;;  %vm291_vm3 = vcmp.eq.s32.totalorder %v221_v7, %v833_v8 }
  0x15   : > { %674 = vmatprep.subr.msk.mxu0 %vm308_vm0, %v768_v13  ;;  %vm306_vm4 = vcmp.eq.s32.totalorder %v236_v9, %v833_v8  ;;  %vm290_vm5 = vcmp.eq.s32.totalorder %v220_v11, %v833_v8  ;;  %vm305_vm6 = vcmp.eq.s32.totalorder %v235_v12, %v833_v8  ;;  %vm289_vm7 = vcmp.eq.s32.totalorder %v219_v14, %v833_v8 }
  0x16   : > { %675 = vmatpush3.msk.msra.mxu0 %vm292_vm1, %v768_v13  ;;  %vm304_vm8 = vcmp.eq.s32.totalorder %v234_v15, %v833_v8  ;;  %vm288_vm9 = vcmp.eq.s32.totalorder %v218_v16, %v833_v8  ;;  %vm303_vm10 = vcmp.eq.s32.totalorder %v233_v17, %v833_v8  ;;  %v231_v21 = vadd.s32 192, %v808_v1 }
  0x17   : > { %676 = vmatprep.subr.msk.mxu0 %vm307_vm2, %v768_v13  ;;  %vm287_vm11 = vcmp.eq.s32.totalorder %v217_v18, %v833_v8  ;;  %v215_v22 = vadd.s32 64, %v808_v1  ;;  %vm302_vm12 = vcmp.eq.s32.totalorder %v232_v19, %v833_v8  ;;  %v230_v23 = vadd.s32 184, %v808_v1 }
  0x18   : > { %677 = vmatpush3.msk.msra.mxu0 %vm291_vm3, %v768_v13  ;;  %vm286_vm13 = vcmp.eq.s32.totalorder %v216_v20, %v833_v8  ;;  %v214_v24 = vadd.s32 56, %v808_v1  ;;  %vm301_vm14 = vcmp.eq.s32.totalorder %v231_v21, %v833_v8  ;;  %v229_v25 = vadd.s32 176, %v808_v1 }
  0x19   : > { %678 = vmatprep.subr.msk.mxu0 %vm306_vm4, %v768_v13  ;;  %vm285_vm15 = vcmp.eq.s32.totalorder %v215_v22, %v833_v8  ;;  %v213_v26 = vadd.s32 48, %v808_v1  ;;  %vm300_vm0 = vcmp.eq.s32.totalorder %v230_v23, %v833_v8  ;;  %v228_v27 = vadd.s32 168, %v808_v1 }
  0x1a   : > { %679 = vmatpush3.msk.msra.mxu0 %vm290_vm5, %v768_v13  ;;  %vm284_vm1 = vcmp.eq.s32.totalorder %v214_v24, %v833_v8  ;;  %v212_v28 = vadd.s32 40, %v808_v1  ;;  %vm299_vm2 = vcmp.eq.s32.totalorder %v229_v25, %v833_v8  ;;  %v227_v29 = vadd.s32 160, %v808_v1 }
  0x1b   : > { %680 = vmatprep.subr.msk.mxu0 %vm305_vm6, %v768_v13  ;;  %vm283_vm3 = vcmp.eq.s32.totalorder %v213_v26, %v833_v8  ;;  %v211_v30 = vadd.s32 32, %v808_v1  ;;  %vm298_vm4 = vcmp.eq.s32.totalorder %v228_v27, %v833_v8  ;;  %v226_v31 = vadd.s32 152, %v808_v1 }
  0x1c   : > { %681 = vmatpush3.msk.msra.mxu0 %vm289_vm7, %v768_v13  ;;  %vm282_vm5 = vcmp.eq.s32.totalorder %v212_v28, %v833_v8  ;;  %v210_v32 = vadd.s32 24, %v808_v1  ;;  %vm297_vm6 = vcmp.eq.s32.totalorder %v227_v29, %v833_v8  ;;  %v225_v33 = vadd.s32 144, %v808_v1 }
  0x1d   : > { %682 = vmatprep.subr.msk.mxu0 %vm304_vm8, %v768_v13  ;;  %vm281_vm7 = vcmp.eq.s32.totalorder %v211_v30, %v833_v8  ;;  %v209_v34 = vadd.s32 16, %v808_v1  ;;  %vm296_vm8 = vcmp.eq.s32.totalorder %v226_v31, %v833_v8  ;;  %v224_v35 = vadd.s32 136, %v808_v1 }
  0x1e   : > { %683 = vmatpush3.msk.msra.mxu0 %vm288_vm9, %v768_v13  ;;  %vm280_vm9 = vcmp.eq.s32.totalorder %v210_v32, %v833_v8  ;;  %v208_v36 = vadd.s32 8, %v808_v1  ;;  %v223_v37 = vadd.s32 128, %v808_v1  ;;  %v484_v49 = vadd.s32 %v483_v45, %v808_v1 }
  0x1f   : > { %684 = vmatprep.subr.msk.mxu0 %vm303_vm10, %v768_v13  ;;  %vm295_vm10 = vcmp.eq.s32.totalorder %v225_v33, %v833_v8 }
  0x20   : > { %685 = vmatpush3.msk.msra.mxu0 %vm287_vm11, %v768_v13  ;;  %vm279_vm11 = vcmp.eq.s32.totalorder %v209_v34, %v833_v8 }
  0x21   : > { %686 = vmatprep.subr.msk.mxu0 %vm302_vm12, %v768_v13  ;;  %vm294_vm12 = vcmp.eq.s32.totalorder %v224_v35, %v833_v8 }
  0x22   : > { %687 = vmatpush3.msk.msra.mxu0 %vm286_vm13, %v768_v13  ;;  %vm278_vm13 = vcmp.eq.s32.totalorder %v208_v36, %v833_v8 }
  0x23   : > { %688 = vmatprep.subr.msk.mxu0 %vm301_vm14, %v768_v13  ;;  %vm293_vm14 = vcmp.eq.s32.totalorder %v223_v37, %v833_v8 }
  0x24   : > { %689 = vmatpush3.msk.msra.mxu0 %vm285_vm15, %v768_v13  ;;  %vm277_vm15 = vcmp.eq.s32.totalorder %v808_v1, %v833_v8 }
  0x25   : > { %690 = vmatprep.subr.msk.mxu0 %vm300_vm0, %v768_v13  ;;  %vm203_vm0 = vcmask 130048  }
  0x26   : > { %691 = vmatpush3.msk.msra.mxu0 %vm284_vm1, %v768_v13  ;;  %204 = vst.msk [vmem:[#allocation2] sm:$0xff] %vm203_vm0, %v769_v39  ;;  %vm453_vm1 = vcmp.ne.s32.totalorder %v816_v2, 0 }
  0x27   : > { %692 = vmatprep.subr.msk.mxu0 %vm299_vm2, %v768_v13  ;;  %v454_v47 = vsel %vm453_vm1, 1, %v770_v46  ;;  %vm485_vm2 = vcmp.eq.s32.totalorder %v482_v48, %v484_v49  ;;  %v668_v62 = vsel %vm453_vm1, 1.0, %v769_v39 }
  0x28   : > { %693 = vmatpush3.msk.msra.mxu0 %vm283_vm3, %v768_v13  ;;  %v459_v50 = vrot.slane %v454_v47, %v820_v4  ;;  %v472_v1 = vrot.slane %v668_v62, %v820_v4 }
  0x29   : > { %694 = vmatprep.subr.msk.mxu0 %vm298_vm4, %v768_v13  ;;  %vm508_vm4 = vcmask 7168  }
  0x2a   : > { %695 = vmatpush3.msk.msra.mxu0 %vm282_vm5, %v768_v13  ;;  %vm460_vm3 = vcmp.eq.s32.totalorder %v459_v50, 1  ;;  %v490_v6 = vsel %vm485_vm2, %v472_v1, 0.0 }
  0x2b   : > { %696 = vmatprep.subr.msk.mxu0 %vm297_vm6, %v768_v13  ;;  %v491_v8 = vsel %vm203_vm0, %v490_v6, 0.0 }
  0x2c   : > { %697 = vmatpush3.msk.msra.mxu0 %vm281_vm7, %v768_v13 }
  0x2d   : > { %698 = vmatprep.subr.msk.mxu0 %vm296_vm8, %v768_v13  ;;  %v375_v41 = vld [vmem:[#allocation2] sm:$0xff] }
  0x2e   : > { %699 = vmatpush3.msk.msra.mxu0 %vm280_vm9, %v768_v13 }
  0x2f   : > { %700 = vmatprep.subr.msk.mxu0 %vm295_vm10, %v768_v13 }
  0x30   : > { %701 = vmatpush3.msk.msra.mxu0 %vm279_vm11, %v768_v13 }
  0x31   : > { %702 = vmatprep.subr.msk.mxu0 %vm294_vm12, %v768_v13 }
  0x32   : > { %703 = vmatpush3.msk.msra.mxu0 %vm278_vm13, %v768_v13 }
  0x33   : > { %704 = vmatprep.subr.msk.mxu0 %vm293_vm14, %v768_v13 }
  0x34   : > { %705 = vmatpush3.msk.msra.mxu0 %vm277_vm15, %v768_v13 }
  0x35   : > { %441 = vmatmul.mubr.f32.vlgmr.msra.gmra.mxu0 %v373_v38 }
  0xf5   : > { %v706_v40 = vpop.f32.mrf.mxu0 }
  0xf7   : > { %v707_v42 = vpop.f32.mrf.mxu0 }
  0xf8   : > { %v708_v43 = vadd.f32 %v707_v42, %v706_v40 }
  0xfa   : > { %v446_v44 = vadd.f32 %v708_v43, %v375_v41 }
  0xfc   : > { %448 = vst.msk [vmem:[#allocation2] sm:$0xff] %vm203_vm0, %v446_v44 }
 0x103   : > { %v452_v51 = vld [vmem:[#allocation2] sm:$0xff] }
 0x104   : > { %v486_v52 = vsel %vm485_vm2, %v452_v51, 0.0  ;;  %v461_v54 = vsel %vm460_vm3, %v452_v51, -1e+30 }
 0x105   : > { %v487_v53 = vsel %vm203_vm0, %v486_v52, 0.0  ;;  %v462_v55 = vsel %vm203_vm0, %v461_v54, -inf }
 0x106   : > { %488 = vadd.xlane.f32.xlu0 %v487_v53 }
 0x10a   : > { %463 = vmax.xlane.f32.xlu0 %v462_v55 }
 0x18f   : > { %v489_v56 = vpop.xlane.xlu0 %488 }
 0x190   : > { %v494_v57 = vsub.f32 %v489_v56, %v452_v51 }
 0x192   : > { %v670_v58 = vmul.f32 -1.442695, %v494_v57 }
 0x193   : > { %v464_v59 = vpop.xlane.xlu0 %463 }
 0x194   : > { %736 = vpow2.f32 %v670_v58  ;;  %v465_v60 = vsub.f32 %v461_v54, %v464_v59 }
 0x196   : > { %v466_v61 = vmul.f32 1.442695, %v465_v60 }
 0x198   : > { %738 = vpow2.f32 %v466_v61 }
 0x1a1   : > { %v737_v63 = vpop.eup %736 }
 0x1a2   : > { %v498_v0 = vadd.f32 1.0, %v737_v63 }
 0x1a4   : > { %740 = vrcp.f32 %v498_v0 }
 0x1a5   : > { %v739_v3 = vpop.eup %738 }
 0x1a6   : > { %v474_v5 = vmul.f32 %v739_v3, %v472_v1 }
 0x1a8   : > { %v475_v7 = vsel %vm203_vm0, %v474_v5, 0.0 }
 0x1a9   : > { %476 = vadd.xlane.f32.xlu1 %v475_v7 }
 0x1ad   : > { %492 = vadd.xlane.f32.xlu1 %v491_v8 }
 0x1b1   : > { %v741_v9 = vpop.eup %740 }
 0x1b2   : > { %v501_v10 = vmul.f32 %v741_v9, %v474_v5 }
 0x1b4   : > { %v502_v2 = vsel %vm203_vm0, %v501_v10, 0.0 }
 0x1b5   : > { %503 = vadd.xlane.f32.xlu0 %v502_v2 }
 0x232   : > { %v477_v11 = vpop.xlane.xlu1 %476 }
 0x233   : > { %742 = vrcp.f32 %v477_v11 }
 0x236   : > { %v493_v4 = vpop.xlane.xlu1 %492 }
 0x23e   : > { %v504_v12 = vpop.xlane.xlu0 %503 }
 0x23f   : > { %v505_v13 = vmul.f32 %v504_v12, %v493_v4 }
 0x240   : > { %v743_v14 = vpop.eup %742 }
 0x241   : > { %v507_v15 = vmul.f32 %v743_v14, %v505_v13 }
 0x243   : > { %509 = vst.msk [vmem:[%s198_s24] sm:$0xff] %vm508_vm4, %v507_v15 }
 0x244 PF: > { %s12_s11 = sadd.s32 1, %s766_s11   ;;  %s964_s9 = smov %s762_s10 }
 0x245   : > { %p9_p5 = scmp.ge.s32.totalorder %s12_s11, 4   ;;  %s965_s10 = smov %s967_s12 }
 0x247   :  { %11 = sbr.rel (!%p9_p5) target bundleno = 2 (0x2), region = 66 }

</bundles_post_ra>
